<compile_context>
chip_gen: v7x
topology: tpu7x:2x2x1
jax: 0.10.0
libtpu: 0.0.40
codegen_flags: <defaults>
</compile_context>

<pallas_src>
import jax
import jax.numpy as jnp
from jax.experimental import pallas as pl
from jax.experimental.pallas import tpu as pltpu


def quadratic1d_kernel(p_ref, o_ref):
    # p_ref: (2,) f32 in SMEM -> [x, y];  o_ref: (1,) f32 in SMEM.
    # Pure scalar-unit math: 100 * x^2 - y.
    x = p_ref[0]
    y = p_ref[1]
    o_ref[0] = 100.0 * x * x - y


def quadratic1d_forward(x, y):
    """Compute 100 * x**2 - y via a (scalar, SMEM-resident) Pallas TPU kernel.

    x, y: float32 arrays of shape (1,), matching nn.Parameter(torch.ones(1))
    and torch.tensor([1.0]) from the PyTorch module.
    """
    # Fuse the two tiny inputs into a single (2,) vector: one DMA descriptor,
    # one SMEM buffer, instead of two.
    params = jnp.concatenate([x.astype(jnp.float32), y.astype(jnp.float32)])
    return pl.pallas_call(
        quadratic1d_kernel,
        out_shape=jax.ShapeDtypeStruct((1,), jnp.float32),
        in_specs=[pl.BlockSpec(memory_space=pltpu.MemorySpace.SMEM)],
        out_specs=pl.BlockSpec(memory_space=pltpu.MemorySpace.SMEM),
    )(params)


if __name__ == "__main__":
    # Deterministic parameter initialization per the module's __init__:
    #   self.x = nn.Parameter(torch.ones(1)); self.y = torch.tensor([1.0])
    # (PRNGKey(0) kept for interface consistency; init is deterministic anyway.)
    _ = jax.random.PRNGKey(0)
    x = jnp.ones((1,), dtype=jnp.float32)
    y = jnp.array([1.0], dtype=jnp.float32)

    out = jax.block_until_ready(quadratic1d_forward(x, y))

    expected = 100.0 * x * x - y  # = [99.0]
    assert out.shape == (1,)
    assert out.dtype == jnp.float32
    assert jnp.allclose(out, expected), (out, expected)
    print("KERNEL_OK")
</pallas_src>

<mosaic_0001>
module attributes {stable_mosaic.version = 11 : i64} {
  func.func @quadratic1d_kernel(%arg0: memref<2xf32, #tpu.memory_space<smem>>, %arg1: memref<1xf32, #tpu.memory_space<smem>>) attributes {dimension_semantics = [], scalar_prefetch = 0 : i64, scratch_operands = 0 : i64, tpu.core_type = #tpu.core_type<tc>} {
    %c0 = arith.constant 0 : index
    %0 = memref.load %arg0[%c0] : memref<2xf32, #tpu.memory_space<smem>>
    %c1 = arith.constant 1 : index
    %1 = memref.load %arg0[%c1] : memref<2xf32, #tpu.memory_space<smem>>
    %cst = arith.constant 1.000000e+02 : f32
    %2 = arith.mulf %cst, %0 : f32
    %3 = arith.mulf %2, %0 : f32
    %4 = arith.subf %3, %1 : f32
    %c0_0 = arith.constant 0 : index
    %5 = memref.load %arg1[%c0_0] : memref<1xf32, #tpu.memory_space<smem>>
    memref.store %4, %arg1[%c0_0] : memref<1xf32, #tpu.memory_space<smem>>
    return
  }
}

</mosaic_0001>

<bundles_post_ra>
// kernel: tpu_custom_call.1
= control target key start
LH: loop header
LB: loop body
LE: loop exit
PB: predicated region body
PF: predicated region fallthrough
CT: control target
= control target key end

     0   :  { %6 = vsyncpa [#allocation3], 0  ;;  %s104_s0 = inlined_call_operand.hbm [shape: f32[2], index: 0, kind: input, shape index: {}]   ;;  %s105_s1 = inlined_call_operand.hbm [shape: f32[1], index: 1, kind: output, shape index: {}]  }
   0x1   :  { %7 = vsyncpa [#allocation4], 0  ;;  %s44_s8 = scalar_lea.hbm %s104_s0, 16 }
   0x2   :  { %p45_p0 = scmp.ne.s32.totalorder %s104_s0, %s44_s8  ;;  %p48_p1 = scmp.lt.u32.totalorder %s44_s8, %s104_s0 }
   0x4   :  { %p50_p2 = pnand %p48_p1, %p45_p0 }
   0x6   :  { %53 = shalt.err (!%p50_p2)
}
   0x7   :  { %s68_s13 = smov [#allocation2]  }
   0x8   :  { %15 = dma.hbm_to_smem %s104_s0, 16, %s68_s13, [#allocation3]  }
   0x9   :  { %64 = dma.done.wait [#allocation3], 16  }
   0xa   :  { %65 = vsyncadd [#allocation3], 4294967280 }
   0xb   :  { %19 = sfence }
   0xc   :  { %s20_s16 = sld [smem:[#allocation2]]  ;;  %s41_s17 = sld [smem:[#allocation2 + $0x1]] }
   0xd   :  { %s54_s23 = scalar_lea.hbm %s105_s1, 16 }
   0xe   :  { %p55_p3 = scmp.ne.s32.totalorder %s105_s1, %s54_s23  ;;  %p58_p4 = scmp.lt.u32.totalorder %s54_s23, %s105_s1 }
  0x10   :  { %p60_p5 = pnand %p58_p4, %p55_p3 }
  0x12   :  { %s22_s18 = smul.f32 100.0, %s20_s16 }
  0x14   :  { %s23_s19 = smul.f32 %s22_s18, %s20_s16 }
  0x16   :  { %s24_s20 = ssub.f32 %s23_s19, %s41_s17 }
  0x18   :  { %26 = sst [smem:[#allocation5]] %s24_s20 }
  0x19   :  { %63 = shalt.err (!%p60_p5)
}
  0x1a   :  { %s69_s0 = smov [#allocation5]  }
  0x1b   :  { %34 = dma.smem_to_hbm %s69_s0, 16, %s105_s1, [#allocation4]  }
  0x1c   :  { %66 = dma.done.wait [#allocation4], 16  }
  0x1d   :  { %67 = vsyncadd [#allocation4], 4294967280 }
  0x1e   :  { %38 = sfence }
  0x1f   :  { %39 = vsyncpa [#allocation3], 1 }
  0x20   :  { %40 = vsyncpa [#allocation4], 1 }

</bundles_post_ra>
